<compile_context>
chip_gen: v7x
topology: tpu7x:2x2x1
jax: 0.10.0
libtpu: 0.0.40
codegen_flags: <defaults>
</compile_context>

<pallas_src>
import jax
import jax.numpy as jnp
from jax.experimental import pallas as pl
from jax.experimental.pallas import tpu as pltpu


def _round_up(n, m):
    return (n + m - 1) // m * m


def _gate_kernel(x_ref, wg_ref, bg_ref, wf_ref, bf_ref, o_ref):
    # x_ref:  (Bb, C, TN)      channels-major activation block
    # wg_ref: (G*C/2, C)       stacked gate weights (PyTorch (out, in) layout)
    # bg_ref: (G*C/2, 1)  f32  stacked gate biases
    # wf_ref: (C/2, G*C/2)     final-gate weight
    # bf_ref: (C/2, 1)    f32  final-gate bias
    # o_ref:  (Bb, C/2, TN)
    wg = wg_ref[...]
    wf = wf_ref[...]
    bg = bg_ref[...].astype(jnp.float32)
    bf = bf_ref[...].astype(jnp.float32)
    bb = x_ref.shape[0]
    for b in range(bb):  # small static unroll (bb <= 16)
        x = x_ref[b]
        h = jnp.dot(wg, x, preferred_element_type=jnp.float32) + bg
        # sigmoid(z) == 0.5 * (tanh(z / 2) + 1): one EUP transcendental per vreg
        h = 0.5 * (jnp.tanh(0.5 * h) + 1.0)
        h = h.astype(wf.dtype)  # native low-precision MXU path when bf16
        out = jnp.dot(wf, h, preferred_element_type=jnp.float32) + bf
        o_ref[b] = out.astype(o_ref.dtype)


def multi_head_gate_pallas(x, gate_ws, gate_bs, final_w, final_b, *,
                           col_tile=None, compute_dtype=None, out_dtype=None):
    """Fused MultiHeadGate forward.

    x:        (B, C, D, H, W)
    gate_ws:  list of (C/2, C)   (PyTorch nn.Linear weight layout)
    gate_bs:  list of (C/2,)
    final_w:  (C/2, G*C/2)
    final_b:  (C/2,)
    returns   (B, C/2, D, H, W) in `out_dtype` (default: x.dtype)
    """
    B, C, D, H, W = x.shape
    G = len(gate_ws)
    half = C // 2
    gdim = G * half
    S = D * H * W

    compute_dtype = jnp.dtype(x.dtype if compute_dtype is None else compute_dtype)
    out_dtype = jnp.dtype(x.dtype if out_dtype is None else out_dtype)

    # ---- glue (plain JAX): pure reshape + tiny parameter packing only ----
    x3 = x.reshape(B, C, S)                                   # no data movement
    if x3.dtype != compute_dtype:
        x3 = x3.astype(compute_dtype)

    wg = jnp.concatenate(gate_ws, axis=0).astype(compute_dtype)        # (gdim, C)
    wf = final_w.astype(compute_dtype)                                 # (half, gdim)
    # Biases stay f32: the kernel adds them in f32 anyway, and they are a few KB.
    bg = jnp.concatenate(gate_bs, axis=0).reshape(gdim, 1).astype(jnp.float32)
    bf = final_b.reshape(half, 1).astype(jnp.float32)

    isz = compute_dtype.itemsize
    osz = out_dtype.itemsize

    # ---- generation-aware VMEM budget ----
    try:
        vmem_cap = int(pltpu.get_tpu_info().vmem_capacity_bytes)
    except Exception:
        vmem_cap = 128 * 2**20
    budget = vmem_cap // 2            # <= ~32 MiB on v7x, <= ~64 MiB on v5e/v6e

    # Parameter blocks have constant index maps; single-buffer them once they
    # are big enough to matter (large C), otherwise default double-buffering.
    param_mode = pl.Buffered(1) if C >= 1024 else None
    param_bufs = 1 if C >= 1024 else 2
    param_bytes = param_bufs * (gdim * C * isz + gdim * 4 + half * gdim * isz + half * 4)

    # Bytes per effective column of work:
    #   double-buffered in/out tiles + f32 intermediates (h and pre-cast out).
    per_col = 2 * (C * isz + half * osz) + (gdim + half) * 4
    max_cols = max(128, (budget - param_bytes - 2 * 2**20) // per_col)

    def param_specs():
        kw = {} if param_mode is None else {"pipeline_mode": param_mode}
        idx = lambda *_: (0, 0)
        return [pl.BlockSpec((gdim, C), idx, **kw),
                pl.BlockSpec((gdim, 1), idx, **kw),
                pl.BlockSpec((half, gdim), idx, **kw),
                pl.BlockSpec((half, 1), idx, **kw)]

    if S <= 512 and col_tile is None:
        # Small spatial extent: block several batch elements per grid step so
        # the per-step work stays above the ~0.35 us grid-step overhead floor.
        # Trailing (C, S) block equals the full array dims -> tiling OK.
        bb = int(max(1, min(B, 16, max_cols // max(S, 1))))
        grid = (pl.cdiv(B, bb),)
        in_specs = [pl.BlockSpec((bb, C, S), lambda i: (i, 0, 0))] + param_specs()
        out_spec = pl.BlockSpec((bb, half, S), lambda i: (i, 0, 0))
        ncols = bb * S
        semantics = ("parallel",)
    else:
        # Lane-dense spatial tiling.  Ragged trailing tile handled by Pallas
        # (OOB reads padded, OOB writes masked); no wrapper pad / slice.
        cap = col_tile if col_tile is not None else (16384 if C <= 256 else 4096)
        tn = int(min(cap, max_cols, _round_up(S, 128)))
        tn = max(128, (tn // 128) * 128)
        grid = (B, pl.cdiv(S, tn))
        in_specs = [pl.BlockSpec((1, C, tn), lambda b, j: (b, 0, j))] + param_specs()
        out_spec = pl.BlockSpec((1, half, tn), lambda b, j: (b, 0, j))
        ncols = tn
        semantics = ("parallel", "parallel")

    footprint = (2 * ncols * (C * isz + half * osz)       # double-buffered I/O
                 + ncols * (gdim + half) * 4              # f32 intermediates
                 + param_bytes)
    vmem_limit = int(min(budget, max(2 * footprint, 8 * 2**20)))

    out3 = pl.pallas_call(
        _gate_kernel,
        out_shape=jax.ShapeDtypeStruct((B, half, S), out_dtype),
        grid_spec=pltpu.PrefetchScalarGridSpec(
            num_scalar_prefetch=0,
            grid=grid,
            in_specs=in_specs,
            out_specs=out_spec,
        ),
        compiler_params=pltpu.CompilerParams(
            dimension_semantics=semantics,
            vmem_limit_bytes=vmem_limit,
        ),
    )(x3, wg, bg, wf, bf)

    return out3.reshape(B, half, D, H, W)


def _reference(x, gate_ws, gate_bs, final_w, final_b):
    # Pure-JAX reference matching the PyTorch forward (f32).
    xp = jnp.transpose(x, (0, 2, 3, 4, 1))                     # (B, D, H, W, C)
    gate_outs = [jax.nn.sigmoid(xp @ w.T + b) for w, b in zip(gate_ws, gate_bs)]
    cat = jnp.concatenate(gate_outs, axis=-1)
    out = cat @ final_w.T + final_b
    return jnp.transpose(out, (0, 4, 1, 2, 3))                 # (B, C/2, D, H, W)


if __name__ == "__main__":
    # Small, module-consistent shapes.
    in_dim = 32
    num_heads = [4, 8]          # only len(num_heads) matters for the module
    G = len(num_heads)
    half = in_dim // 2
    B, D, H, W = 2, 4, 4, 4     # 5-D input: (B, C, D, H, W)

    key = jax.random.PRNGKey(0)
    keys = jax.random.split(key, 2 * G + 4)

    # Deterministic parameters (PyTorch Linear shapes: W (out, in), b (out,))
    gate_ws = [0.1 * jax.random.normal(keys[i], (half, in_dim), jnp.float32)
               for i in range(G)]
    gate_bs = [0.1 * jax.random.normal(keys[G + i], (half,), jnp.float32)
               for i in range(G)]
    final_w = 0.1 * jax.random.normal(keys[2 * G], (half, G * half), jnp.float32)
    final_b = 0.1 * jax.random.normal(keys[2 * G + 1], (half,), jnp.float32)

    x = jax.random.normal(keys[2 * G + 2], (B, in_dim, D, H, W), jnp.float32)

    # --- f32 path, small-S batch-blocked route ---
    out_f32 = jax.block_until_ready(
        multi_head_gate_pallas(x, gate_ws, gate_bs, final_w, final_b))
    ref = _reference(x, gate_ws, gate_bs, final_w, final_b)
    assert out_f32.shape == (B, half, D, H, W), out_f32.shape
    assert jnp.allclose(out_f32, ref, atol=1e-4, rtol=1e-4), float(
        jnp.max(jnp.abs(out_f32 - ref)))

    # --- bf16 activations (biases stay f32 inside the wrapper) ---
    x_bf16 = x.astype(jnp.bfloat16)
    out_bf16 = jax.block_until_ready(
        multi_head_gate_pallas(x_bf16, gate_ws, gate_bs, final_w, final_b))
    ref_bf16 = _reference(x_bf16.astype(jnp.float32), gate_ws, gate_bs,
                          final_w, final_b)
    assert out_bf16.dtype == jnp.bfloat16
    assert jnp.allclose(out_bf16.astype(jnp.float32), ref_bf16,
                        atol=3e-2, rtol=3e-2), float(
        jnp.max(jnp.abs(out_bf16.astype(jnp.float32) - ref_bf16)))

    # --- ragged-S spatial-tiling route: S = 4*10*13 = 520, forced 256-wide
    #     tiles -> partial trailing block exercises OOB read/write masking ---
    x2 = jax.random.normal(keys[2 * G + 3], (1, in_dim, 4, 10, 13), jnp.float32)
    out_r = jax.block_until_ready(
        multi_head_gate_pallas(x2, gate_ws, gate_bs, final_w, final_b,
                               col_tile=256))
    ref_r = _reference(x2, gate_ws, gate_bs, final_w, final_b)
    assert out_r.shape == (1, half, 4, 10, 13), out_r.shape
    assert jnp.allclose(out_r, ref_r, atol=1e-4, rtol=1e-4), float(
        jnp.max(jnp.abs(out_r - ref_r)))

    print("KERNEL_OK")
</pallas_src>

<mosaic_0001>
module attributes {stable_mosaic.version = 11 : i64} {
  func.func @_gate_kernel(%arg0: i32, %arg1: memref<2x32x64xf32, #tpu.memory_space<vmem>>, %arg2: memref<32x32xf32, #tpu.memory_space<vmem>>, %arg3: memref<32x1xf32, #tpu.memory_space<vmem>>, %arg4: memref<16x32xf32, #tpu.memory_space<vmem>>, %arg5: memref<16x1xf32, #tpu.memory_space<vmem>>, %arg6: memref<2x16x64xf32, #tpu.memory_space<vmem>>) attributes {dimension_semantics = [#tpu.dimension_semantics<parallel>], iteration_bounds = array<i64: 1>, scalar_prefetch = 0 : i64, scratch_operands = 0 : i64, tpu.core_type = #tpu.core_type<tc>, window_params = [{transform_indices = @transform_0, window_bounds = array<i64: 2, 32, 64>}, {pipeline_mode = #tpu.pipeline_mode<synchronous>, transform_indices = @transform_1, window_bounds = array<i64: 32, 32>}, {pipeline_mode = #tpu.pipeline_mode<synchronous>, transform_indices = @transform_2, window_bounds = array<i64: 32, 1>}, {pipeline_mode = #tpu.pipeline_mode<synchronous>, transform_indices = @transform_3, window_bounds = array<i64: 16, 32>}, {pipeline_mode = #tpu.pipeline_mode<synchronous>, transform_indices = @transform_4, window_bounds = array<i64: 16, 1>}, {transform_indices = @transform_5, window_bounds = array<i64: 2, 16, 64>}]} {
    %c0 = arith.constant 0 : index
    %c0_0 = arith.constant 0 : index
    %0 = vector.load %arg2[%c0, %c0_0] : memref<32x32xf32, #tpu.memory_space<vmem>>, vector<32x32xf32>
    %c0_1 = arith.constant 0 : index
    %c0_2 = arith.constant 0 : index
    %1 = vector.load %arg4[%c0_1, %c0_2] : memref<16x32xf32, #tpu.memory_space<vmem>>, vector<16x32xf32>
    %c0_3 = arith.constant 0 : index
    %c0_4 = arith.constant 0 : index
    %2 = vector.load %arg3[%c0_3, %c0_4] : memref<32x1xf32, #tpu.memory_space<vmem>>, vector<32x1xf32>
    %c0_5 = arith.constant 0 : index
    %c0_6 = arith.constant 0 : index
    %3 = vector.load %arg5[%c0_5, %c0_6] : memref<16x1xf32, #tpu.memory_space<vmem>>, vector<16x1xf32>
    %c0_7 = arith.constant 0 : index
    %c0_8 = arith.constant 0 : index
    %c0_9 = arith.constant 0 : index
    %4 = vector.load %arg1[%c0_7, %c0_8, %c0_9] : memref<2x32x64xf32, #tpu.memory_space<vmem>>, vector<1x32x64xf32>
    %5 = vector.shape_cast %4 : vector<1x32x64xf32> to vector<32x64xf32>
    %cst = arith.constant dense<0.000000e+00> : vector<32x64xf32>
    %6 = tpu.matmul %0, %5, %cst {dimension_numbers = #tpu.dot_dimension_numbers<[1], [0], [0], [1], [0, 0, 1, 1], [], []>} : vector<32x32xf32>, vector<32x64xf32>, vector<32x64xf32> -> vector<32x64xf32>
    %7 = vector.broadcast %2 : vector<32x1xf32> to vector<32x64xf32>
    %8 = arith.addf %6, %7 : vector<32x64xf32>
    %cst_10 = arith.constant 5.000000e-01 : f32
    %9 = vector.broadcast %cst_10 : f32 to vector<32x64xf32>
    %10 = arith.mulf %9, %8 : vector<32x64xf32>
    %11 = math.tanh %10 : vector<32x64xf32>
    %cst_11 = arith.constant 1.000000e+00 : f32
    %12 = vector.broadcast %cst_11 : f32 to vector<32x64xf32>
    %13 = arith.addf %11, %12 : vector<32x64xf32>
    %cst_12 = arith.constant 5.000000e-01 : f32
    %14 = vector.broadcast %cst_12 : f32 to vector<32x64xf32>
    %15 = arith.mulf %14, %13 : vector<32x64xf32>
    %cst_13 = arith.constant dense<0.000000e+00> : vector<16x64xf32>
    %16 = tpu.matmul %1, %15, %cst_13 {dimension_numbers = #tpu.dot_dimension_numbers<[1], [0], [0], [1], [0, 0, 1, 1], [], []>} : vector<16x32xf32>, vector<32x64xf32>, vector<16x64xf32> -> vector<16x64xf32>
    %17 = vector.broadcast %3 : vector<16x1xf32> to vector<16x64xf32>
    %18 = arith.addf %16, %17 : vector<16x64xf32>
    %c0_14 = arith.constant 0 : index
    %c0_15 = arith.constant 0 : index
    %c0_16 = arith.constant 0 : index
    %19 = vector.load %arg6[%c0_14, %c0_15, %c0_16] : memref<2x16x64xf32, #tpu.memory_space<vmem>>, vector<1x16x64xf32>
    %20 = vector.shape_cast %19 : vector<1x16x64xf32> to vector<16x64xf32>
    %21 = vector.shape_cast %18 : vector<16x64xf32> to vector<1x16x64xf32>
    tpu.vector_store %arg6[%c0_14, %c0_15, %c0_16], %21 {strides = array<i32>} : memref<2x16x64xf32, #tpu.memory_space<vmem>>, vector<1x16x64xf32>,
    %c1 = arith.constant 1 : index
    %c0_17 = arith.constant 0 : index
    %c0_18 = arith.constant 0 : index
    %22 = vector.load %arg1[%c1, %c0_17, %c0_18] : memref<2x32x64xf32, #tpu.memory_space<vmem>>, vector<1x32x64xf32>
    %23 = vector.shape_cast %22 : vector<1x32x64xf32> to vector<32x64xf32>
    %cst_19 = arith.constant dense<0.000000e+00> : vector<32x64xf32>
    %24 = tpu.matmul %0, %23, %cst_19 {dimension_numbers = #tpu.dot_dimension_numbers<[1], [0], [0], [1], [0, 0, 1, 1], [], []>} : vector<32x32xf32>, vector<32x64xf32>, vector<32x64xf32> -> vector<32x64xf32>
    %25 = vector.broadcast %2 : vector<32x1xf32> to vector<32x64xf32>
    %26 = arith.addf %24, %25 : vector<32x64xf32>
    %cst_20 = arith.constant 5.000000e-01 : f32
    %27 = vector.broadcast %cst_20 : f32 to vector<32x64xf32>
    %28 = arith.mulf %27, %26 : vector<32x64xf32>
    %29 = math.tanh %28 : vector<32x64xf32>
    %cst_21 = arith.constant 1.000000e+00 : f32
    %30 = vector.broadcast %cst_21 : f32 to vector<32x64xf32>
    %31 = arith.addf %29, %30 : vector<32x64xf32>
    %cst_22 = arith.constant 5.000000e-01 : f32
    %32 = vector.broadcast %cst_22 : f32 to vector<32x64xf32>
    %33 = arith.mulf %32, %31 : vector<32x64xf32>
    %cst_23 = arith.constant dense<0.000000e+00> : vector<16x64xf32>
    %34 = tpu.matmul %1, %33, %cst_23 {dimension_numbers = #tpu.dot_dimension_numbers<[1], [0], [0], [1], [0, 0, 1, 1], [], []>} : vector<16x32xf32>, vector<32x64xf32>, vector<16x64xf32> -> vector<16x64xf32>
    %35 = vector.broadcast %3 : vector<16x1xf32> to vector<16x64xf32>
    %36 = arith.addf %34, %35 : vector<16x64xf32>
    %c1_24 = arith.constant 1 : index
    %c0_25 = arith.constant 0 : index
    %c0_26 = arith.constant 0 : index
    %37 = vector.load %arg6[%c1_24, %c0_25, %c0_26] : memref<2x16x64xf32, #tpu.memory_space<vmem>>, vector<1x16x64xf32>
    %38 = vector.shape_cast %37 : vector<1x16x64xf32> to vector<16x64xf32>
    %39 = vector.shape_cast %36 : vector<16x64xf32> to vector<1x16x64xf32>
    tpu.vector_store %arg6[%c1_24, %c0_25, %c0_26], %39 {strides = array<i32>} : memref<2x16x64xf32, #tpu.memory_space<vmem>>, vector<1x16x64xf32>,
    return
  }
  func.func @transform_0(%arg0: i32) -> (i32, i32, i32) {
    %c0_i32 = arith.constant 0 : i32
    %c0_i32_0 = arith.constant 0 : i32
    %c0_i32_1 = arith.constant 0 : i32
    return %arg0, %c0_i32, %c0_i32_0 : i32, i32, i32
  }
  func.func @transform_1(%arg0: i32) -> (i32, i32) {
    %c0_i32 = arith.constant 0 : i32
    %c0_i32_0 = arith.constant 0 : i32
    %c0_i32_1 = arith.constant 0 : i32
    return %c0_i32, %c0_i32_0 : i32, i32
  }
  func.func @transform_2(%arg0: i32) -> (i32, i32) {
    %c0_i32 = arith.constant 0 : i32
    %c0_i32_0 = arith.constant 0 : i32
    %c0_i32_1 = arith.constant 0 : i32
    return %c0_i32, %c0_i32_0 : i32, i32
  }
  func.func @transform_3(%arg0: i32) -> (i32, i32) {
    %c0_i32 = arith.constant 0 : i32
    %c0_i32_0 = arith.constant 0 : i32
    %c0_i32_1 = arith.constant 0 : i32
    return %c0_i32, %c0_i32_0 : i32, i32
  }
  func.func @transform_4(%arg0: i32) -> (i32, i32) {
    %c0_i32 = arith.constant 0 : i32
    %c0_i32_0 = arith.constant 0 : i32
    %c0_i32_1 = arith.constant 0 : i32
    return %c0_i32, %c0_i32_0 : i32, i32
  }
  func.func @transform_5(%arg0: i32) -> (i32, i32, i32) {
    %c0_i32 = arith.constant 0 : i32
    %c0_i32_0 = arith.constant 0 : i32
    %c0_i32_1 = arith.constant 0 : i32
    return %arg0, %c0_i32, %c0_i32_0 : i32, i32, i32
  }
}

</mosaic_0001>

<bundles_post_ra>
// kernel: tpu_custom_call.1
= control target key start
LH: loop header
LB: loop body
LE: loop exit
PB: predicated region body
PF: predicated region fallthrough
CT: control target
= control target key end

     0   :  { %10 = vsyncpa [#allocation3], 0  ;;  %s790_s0 = inlined_call_operand.hbm [shape: f32[2,32,64], index: 0, kind: input, shape index: {}]   ;;  %s791_s1 = inlined_call_operand.vmem [shape: f32[32,32], index: 1, kind: input, shape index: {}]   ;;  %s792_s2 = inlined_call_operand.vmem [shape: f32[32,1], index: 2, kind: input, shape index: {}]   ;;  %s793_s3 = inlined_call_operand.vmem [shape: f32[16,32], index: 3, kind: input, shape index: {}]   ;;  %s794_s4 = inlined_call_operand.vmem [shape: f32[16,1], index: 4, kind: input, shape index: {}]   ;;  %s795_s5 = inlined_call_operand.hbm [shape: f32[2,16,64], index: 5, kind: output, shape index: {}]  }
   0x1   :  { %11 = vsyncpa [#allocation4], 0  ;;  %s673_s18 = smov [#allocation2]   ;;  %s625_s22 = scalar_lea.hbm %s790_s0, 1024 }
   0x2   :  { %s17_s19 = sshll.u32 %s673_s18, 4  ;;  %p626_p0 = scmp.ne.s32.totalorder %s790_s0, %s625_s22  ;;  %s18_s19 = int_to_ptr.vmem [resolvable:$true] %s17_s19 }
   0x3   :  { %p629_p1 = scmp.lt.u32.totalorder %s625_s22, %s790_s0 }
   0x5   :  { %p631_p2 = pnand %p629_p1, %p626_p0 }
   0x7   :  { %634 = shalt.err (!%p631_p2)
}
   0x8   :  { %s635_s27 = scalar_lea.vmem %s18_s19, 1024  ;;  %p640_p4 = scmp.lt.s32.totalorder %s18_s19, %s18_s19 }
   0x9   :  { %p636_p3 = scmp.ne.s32.totalorder %s18_s19, %s635_s27  ;;  %p641_p5 = scmp.lt.s32.totalorder %s635_s27, %s635_s27 }
   0xb   :  { %p642_p6 = por %p641_p5, %p640_p4 }
   0xd   :  { %p643_p7 = pnand %p642_p6, %p636_p3 }
   0xf   :  { %646 = shalt.err (!%p643_p7)
}
  0x10   :  { %s674_s28 = smov 128   ;;  %s675_s29 = smov 8  }
  0x11   :  { %23 = dma.hbm_to_vmem [thread:$0]  %s790_s0, 1024, %s18_s19, [#allocation3], %s674_s28, %s674_s28, %s675_s29  }
  0x12   :  { %669 = dma.done.wait [#allocation3], 1024  }
  0x13   :  { %670 = vsyncadd [#allocation3], 4294966272  ;;  %v676_v0 = vmov 0   ;;  %vm71_vm0 = vcmask 261120   ;;  %v47_v1 = vld [vmem:[#allocation2] sm:$0xff]  ;;  %v48_v2 = vld [vmem:[#allocation2 + $0x8] sm:$0xff] }
  0x14   :  { %607 = vset.pattern.permute.xlu0 %v676_v0  ;;  %608 = vset.pattern.permute.xlu1 %v676_v0  ;;  %v49_v3 = vld [vmem:[#allocation2 + $0x10] sm:$0xff]  ;;  %v570_v4 = vpack.c.bf16 %v48_v2, %v47_v1  ;;  %v50_v5 = vld [vmem:[#allocation2 + $0x18] sm:$0xff]  ;;  %v35_v6 = vld [vmem:[%s791_s1] sm:$0xff]  ;;  %vm276_vm1 = vcmask 523264  }
  0x15   :  { %v574_v7 = vpack.c.bf16 %v50_v5, %v49_v3  ;;  %528 = vmatprep.mubr.msk.f32.mxu0 %vm71_vm0, %v35_v6  ;;  %v280_v8 = vld [vmem:[#allocation2 + $0x20] sm:$0xff]  ;;  %v281_v9 = vld [vmem:[#allocation2 + $0x28] sm:$0xff]  ;;  %v43_v11 = vld [vmem:[%s792_s2 + $0x10] sm:$0xff] }
  0x16   :  { %571 = vmatprep.subr.bf16.mxu0 %v570_v4  ;;  %v41_v10 = vld [vmem:[%s792_s2] sm:$0xff]  ;;  %v586_v12 = vpack.c.bf16 %v281_v9, %v280_v8  ;;  %v282_v13 = vld [vmem:[#allocation2 + $0x30] sm:$0xff]  ;;  %v283_v14 = vld [vmem:[#allocation2 + $0x38] sm:$0xff]  ;;  %63 = vperm.xlu1 %608, %v43_v11  }
  0x17   :  { %573 = vmatpush3.bf16.msra.mxu0 %v570_v4  ;;  %53 = vperm.xlu0 %607, %v41_v10   ;;  %v42_v15 = vld [vmem:[%s792_s2 + $0x8] sm:$0xff]  ;;  %v44_v16 = vld [vmem:[%s792_s2 + $0x18] sm:$0xff]  ;;  %v37_v18 = vld [vmem:[%s791_s1 + $0x10] sm:$0xff]  ;;  %v590_v19 = vpack.c.bf16 %v283_v14, %v282_v13 }
  0x18   :  { %575 = vmatprep.subr.bf16.mxu0 %v574_v7  ;;  %v36_v17 = vld [vmem:[%s791_s1 + $0x8] sm:$0xff]  ;;  %v45_v20 = vld [vmem:[%s794_s4] sm:$0xff]  ;;  %v38_v22 = vld [vmem:[%s791_s1 + $0x18] sm:$0xff] }
  0x19   :  { %v46_v21 = vld [vmem:[%s794_s4 + $0x8] sm:$0xff]  ;;  %v764_v23 = vld [vmem:[%s793_s3] sm:$0xff] }
  0x1a   :  { %68 = vperm.xlu1 %608, %v44_v16   ;;  %542 = vmatprep.mubr.msk.f32.mxu1 %vm71_vm0, %v764_v23  ;;  %v40_v11 = vld [vmem:[%s793_s3 + $0x8] sm:$0xff]  ;;  %s677_s3 = smov [#allocation5]  }
  0x1b   :  { %577 = vmatpush3.bf16.msra.mxu0 %v574_v7  ;;  %58 = vperm.xlu0 %607, %v42_v15   ;;  %s468_s27 = sshll.u32 %s677_s3, 4  ;;  %s469_s27 = int_to_ptr.vmem [resolvable:$true] %s468_s27 }
  0x1c   :  { %587 = vmatprep.subr.bf16.mxu0 %v586_v12  ;;  %s647_s30 = scalar_lea.vmem %s469_s27, 512  ;;  %p652_p9 = scmp.lt.s32.totalorder %s469_s27, %s469_s27 }
  0x1d   :  { %p648_p8 = scmp.ne.s32.totalorder %s469_s27, %s647_s30  ;;  %p653_p10 = scmp.lt.s32.totalorder %s647_s30, %s647_s30 }
  0x1e   :  { %529 = vmatmul.mubr.msk.f32.vlgmr.msra.gmra.mrb[0].mxu0 %vm71_vm0, %v36_v17  ;;  %192 = vperm.xlu1 %608, %v46_v21  }
  0x1f   :  { %589 = vmatpush3.bf16.msra.mxu0 %v586_v12  ;;  %531 = vmatprep.mubr.msk.f32.mxu0 %vm71_vm0, %v37_v18  ;;  %p654_p11 = por %p653_p10, %p652_p9 }
  0x20   :  { %591 = vmatprep.subr.bf16.mxu0 %v590_v19  ;;  %187 = vperm.xlu0 %607, %v45_v20  }
  0x21   :  { %p655_p12 = pnand %p654_p11, %p648_p8 }
  0x22   :  { %532 = vmatmul.mubr.msk.f32.gmra.mrb[2].mxu0 %vm71_vm0, %v38_v22 }
  0x23   :  { %593 = vmatpush3.bf16.msra.mxu0 %v590_v19  ;;  %553 = vmatprep.mubr.msk.f32.mxu0 %vm71_vm0, %v35_v6 }
  0x26   :  { %554 = vmatmul.mubr.msk.f32.vlgmr.msra.gmra.mrb[4].mxu0 %vm71_vm0, %v36_v17 }
  0x27   :  { %556 = vmatprep.mubr.msk.f32.mxu0 %vm71_vm0, %v37_v18 }
  0x2a   :  { %557 = vmatmul.mubr.msk.f32.gmra.mrb[6].mxu0 %vm71_vm0, %v38_v22 }
  0x95   :  { %v64_v25 = vpop.permute.xlu1 %63 }
  0x96   :  { %v54_v24 = vpop.permute.xlu0 %53 }
  0x99   :  { %v69_v32 = vpop.permute.xlu1 %68 }
  0x9a   :  { %v59_v26 = vpop.permute.xlu0 %58 }
  0x9d   :  { %v193_v17 = vpop.permute.xlu1 %192 }
  0x9f   :  { %v188_v19 = vpop.permute.xlu0 %187 }
  0xf1   :  { %v530_v27 = vpop.f32.mrb[0].mxu0 }
  0xf2   :  { %v156_v28 = vadd.f32 %v530_v27, %v59_v26  ;;  %v150_v29 = vpop.f32.mrb[1].mxu0 }
  0xf3   :  { %v151_v30 = vadd.f32 %v150_v29, %v54_v24 }
  0xf4   :  { %v170_v31 = vmul.f32 0.5, %v156_v28 }
  0xf5   :  { %v169_v33 = vmul.f32 0.5, %v151_v30  ;;  %v533_v34 = vpop.f32.mrb[2].mxu0 }
  0xf6   :  { %609 = vtanh.f32 %v170_v31  ;;  %v166_v35 = vadd.f32 %v533_v34, %v69_v32  ;;  %v160_v36 = vpop.f32.mrb[3].mxu0 }
  0xf7   :  { %611 = vtanh.f32 %v169_v33  ;;  %v161_v37 = vadd.f32 %v160_v36, %v64_v25 }
  0xf8   :  { %v172_v38 = vmul.f32 0.5, %v166_v35 }
  0xf9   :  { %v171_v39 = vmul.f32 0.5, %v161_v37  ;;  %v555_v40 = vpop.f32.mrb[4].mxu0 }
  0xfa   :  { %613 = vtanh.f32 %v172_v38  ;;  %v356_v41 = vadd.f32 %v555_v40, %v59_v26  ;;  %v350_v42 = vpop.f32.mrb[5].mxu0 }
  0xfb   :  { %615 = vtanh.f32 %v171_v39  ;;  %v351_v43 = vadd.f32 %v350_v42, %v54_v24 }
  0xfc   :  { %v370_v44 = vmul.f32 0.5, %v356_v41 }
  0xfd   :  { %v369_v45 = vmul.f32 0.5, %v351_v43  ;;  %v558_v46 = vpop.f32.mrb[6].mxu0 }
  0xfe   :  { %617 = vtanh.f32 %v370_v44  ;;  %v366_v47 = vadd.f32 %v558_v46, %v69_v32  ;;  %v360_v48 = vpop.f32.mrb[7].mxu0 }
  0xff   :  { %619 = vtanh.f32 %v369_v45  ;;  %v361_v49 = vadd.f32 %v360_v48, %v64_v25 }
 0x100   :  { %v610_v50 = vpop.eup %609  ;;  %v372_v51 = vmul.f32 0.5, %v366_v47 }
 0x101   :  { %v612_v52 = vpop.eup %611  ;;  %v371_v53 = vmul.f32 0.5, %v361_v49  ;;  %v178_v54 = vadd.f32 1.0, %v610_v50 }
 0x102   :  { %621 = vtanh.f32 %v372_v51  ;;  %v177_v55 = vadd.f32 1.0, %v612_v52 }
 0x103   :  { %623 = vtanh.f32 %v371_v53  ;;  %v182_v56 = vmul.f32 0.5, %v178_v54 }
 0x104   :  { %v614_v57 = vpop.eup %613  ;;  %v181_v58 = vmul.f32 0.5, %v177_v55 }
 0x105   :  { %v616_v59 = vpop.eup %615  ;;  %v180_v60 = vadd.f32 1.0, %v614_v57 }
 0x106   :  { %v179_v61 = vadd.f32 1.0, %v616_v59  ;;  %v578_v62 = vpack.c.bf16 %v182_v56, %v181_v58 }
 0x107   :  { %v184_v63 = vmul.f32 0.5, %v180_v60 }
 0x108   :  { %v618_v0 = vpop.eup %617  ;;  %v183_v1 = vmul.f32 0.5, %v179_v61  ;;  %579 = vmatprep.subr.bf16.mxu1 %v578_v62 }
 0x109   :  { %v620_v2 = vpop.eup %619  ;;  %v378_v3 = vadd.f32 1.0, %v618_v0  ;;  %581 = vmatpush3.bf16.msra.mxu1 %v578_v62 }
 0x10a   :  { %v377_v4 = vadd.f32 1.0, %v620_v2  ;;  %v582_v5 = vpack.c.bf16 %v184_v63, %v183_v1 }
 0x10b   :  { %v382_v6 = vmul.f32 0.5, %v378_v3 }
 0x10c   :  { %v622_v7 = vpop.eup %621  ;;  %v381_v8 = vmul.f32 0.5, %v377_v4  ;;  %583 = vmatprep.subr.bf16.mxu1 %v582_v5 }
 0x10d   :  { %v624_v9 = vpop.eup %623  ;;  %v380_v10 = vadd.f32 1.0, %v622_v7  ;;  %585 = vmatpush3.bf16.msra.mxu1 %v582_v5 }
 0x10e   :  { %v379_v12 = vadd.f32 1.0, %v624_v9  ;;  %v594_v13 = vpack.c.bf16 %v382_v6, %v381_v8 }
 0x10f   :  { %v384_v14 = vmul.f32 0.5, %v380_v10 }
 0x110   :  { %v383_v15 = vmul.f32 0.5, %v379_v12  ;;  %543 = vmatmul.mubr.msk.f32.vlgmr.msra.gmra.mrb[0].mxu1 %vm71_vm0, %v40_v11  ;;  %595 = vmatprep.subr.bf16.mxu1 %v594_v13 }
 0x111   :  { %597 = vmatpush3.bf16.msra.mxu1 %v594_v13  ;;  %567 = vmatprep.mubr.msk.f32.mxu1 %vm71_vm0, %v764_v23 }
 0x112   :  { %v598_v16 = vpack.c.bf16 %v384_v14, %v383_v15 }
 0x114   :  { %599 = vmatprep.subr.bf16.mxu1 %v598_v16 }
 0x115   :  { %601 = vmatpush3.bf16.msra.mxu1 %v598_v16 }
 0x118   :  { %568 = vmatmul.mubr.msk.f32.vlgmr.msra.gmra.mrb[2].mxu1 %vm71_vm0, %v40_v11 }
 0x1e3   :  { %v544_v18 = vpop.f32.mrb[0].mxu1 }
 0x1e4   :  { %v273_v20 = vadd.f32 %v544_v18, %v193_v17  ;;  %v267_v21 = vpop.f32.mrb[1].mxu1 }
 0x1e5   :  { %v268_v22 = vadd.f32 %v267_v21, %v188_v19 }
 0x1e6   :  { %278 = vst.msk [vmem:[#allocation5 + $0x8] sm:$0xff] %vm276_vm1, %v273_v20 }
 0x1e7   :  { %277 = vst.msk [vmem:[#allocation5] sm:$0xff] %vm276_vm1, %v268_v22 }
 0x1eb   :  { %v569_v24 = vpop.f32.mrb[2].mxu1 }
 0x1ec   :  { %v457_v25 = vadd.f32 %v569_v24, %v193_v17  ;;  %v451_v26 = vpop.f32.mrb[3].mxu1 }
 0x1ed   :  { %v452_v23 = vadd.f32 %v451_v26, %v188_v19 }
 0x1ee   :  { %462 = vst.msk [vmem:[#allocation5 + $0x18] sm:$0xff] %vm276_vm1, %v457_v25 }
 0x1ef   :  { %461 = vst.msk [vmem:[#allocation5 + $0x10] sm:$0xff] %vm276_vm1, %v452_v23 }
 0x1f0   :  { %658 = shalt.err (!%p655_p12)
}
 0x1f1   :  { %s659_s8 = scalar_lea.hbm %s795_s5, 512 }
 0x1f2   :  { %p660_p13 = scmp.ne.s32.totalorder %s795_s5, %s659_s8  ;;  %p663_p0 = scmp.lt.u32.totalorder %s659_s8, %s795_s5 }
 0x1f4   :  { %p665_p1 = pnand %p663_p0, %p660_p13 }
 0x1f6   :  { %668 = shalt.err (!%p665_p1)
}
 0x1f7   :  { %474 = dma.vmem_to_hbm [thread:$0]  %s469_s27, 512, %s795_s5, [#allocation4], %s674_s28, %s674_s28, %s675_s29  }
 0x1f8   :  { %671 = dma.done.wait [#allocation4], 512  }
 0x1f9   :  { %672 = vsyncadd [#allocation4], 4294966784 }
 0x1fa   :  { %478 = vsyncpa [#allocation3], 1 }
 0x1fb   :  { %479 = vsyncpa [#allocation4], 1 }

</bundles_post_ra>
